<compile_context>
chip_gen: v7x
topology: tpu7x:2x2x1
jax: 0.10.0
libtpu: 0.0.40
codegen_flags: <defaults>
</compile_context>

<pallas_src>
import math

import jax
import jax.numpy as jnp
from jax.experimental import pallas as pl
from jax.experimental.pallas import tpu as pltpu


def _sinusoidal_embed_kernel(time_ref, table_ref, out_ref):
    # time_ref : (tb, g)  f32   g packed batch rows per output row
    # table_ref: (2, W)   f32   row 0 = tiled [freqs|freqs], row 1 = tiled [0|pi/2]
    # out_ref  : (tb, W)  f32   W = g * dim (128 when packed)
    tb, g = time_ref.shape
    w = out_ref.shape[1]
    d = w // g

    tab = table_ref[...]            # (2, W)
    freqs = tab[0:1, :]             # (1, W)
    phase = tab[1:2, :]             # (1, W)

    t = time_ref[...]               # (tb, g)
    # Build the lane-dense time operand: lane block i (width d) carries packed
    # row's i-th batch element.  g lane-broadcasts + one lane-concat (XLU).
    cols = [jnp.broadcast_to(t[:, i:i + 1], (tb, d)) for i in range(g)]
    t_full = cols[0] if g == 1 else jnp.concatenate(cols, axis=-1)   # (tb, W)

    # Single full-width transcendental + single unmasked lane-dense store.
    out_ref[...] = jnp.sin(t_full * freqs + phase)


def sinusoidal_position_embedding(time: jax.Array, dim: int) -> jax.Array:
    """Pallas implementation of SinusoidalPositionEmbedding.forward.

    Args:
      time: (B,) array of timesteps (any real dtype; computed in f32).
      dim:  embedding dimension (even, >= 4).

    Returns:
      (B, dim) float32 embedding laid out as [sin | cos].
    """
    assert dim % 2 == 0 and dim >= 4, "dim must be even and >= 4"
    b = time.shape[0]
    half_dim = dim // 2

    # ---- constant tables (computed once, outside the kernel, like the ref) --
    scale = math.log(10000.0) / (half_dim - 1)
    freqs = jnp.exp(jnp.arange(half_dim, dtype=jnp.float32) * (-scale))       # (half,)
    freqs_full = jnp.concatenate([freqs, freqs])                              # (dim,)
    phase_full = jnp.concatenate(
        [jnp.zeros((half_dim,), jnp.float32),
         jnp.full((half_dim,), jnp.pi / 2, jnp.float32)])                     # (dim,)

    # ---- lane packing factor ------------------------------------------------
    # Fold g batch rows per 128-lane output row when dim < 128 and divides 128.
    if dim < 128 and 128 % dim == 0:
        g = 128 // dim
    else:
        g = 1                     # dim >= 128 (ideally a multiple of 128): already lane-dense
    w = g * dim

    # Single merged (2, W) table: row 0 freqs, row 1 phase (one BlockSpec / buffer).
    table = jnp.stack([jnp.tile(freqs_full, g), jnp.tile(phase_full, g)])     # (2, W)

    # Pad batch to a multiple of g so the packed view is rectangular.
    b_pad = -(-b // g) * g
    t32 = time.astype(jnp.float32)
    if b_pad != b:
        t32 = jnp.concatenate([t32, jnp.zeros((b_pad - b,), jnp.float32)])
    rows = b_pad // g
    time_packed = t32.reshape(rows, g)                                        # (rows, g)

    # ---- batch tile size ----------------------------------------------------
    # Target ~4 MiB output per grid step (double-buffered ~8 MiB: fits the
    # default scoped VMEM on v5e/v6e/v7x), multiple of 8 sublanes, and — when
    # there are enough rows — at most ceil(rows/2) so v7x's two TensorCores
    # both get grid steps via the "parallel" axis.
    bytes_per_row = w * 4
    tb = max(8, ((4 << 20) // bytes_per_row) // 8 * 8)
    if rows >= 16:
        half_rows = -(-rows // 2)
        tb = min(tb, ((half_rows + 7) // 8) * 8)
    if tb >= rows:
        tb = rows                 # single full-extent block (always a legal block shape)
    grid = (pl.cdiv(rows, tb),)

    # Ragged final block: Pallas masks the out-of-bounds writeback, and the
    # computation is purely elementwise per row, so padded-row garbage cannot
    # leak into valid rows.
    packed = pl.pallas_call(
        _sinusoidal_embed_kernel,
        out_shape=jax.ShapeDtypeStruct((rows, w), jnp.float32),
        grid=grid,
        in_specs=[
            pl.BlockSpec((tb, g), lambda i: (i, 0)),     # packed time rows for this tile
            pl.BlockSpec((2, w), lambda i: (0, 0)),      # merged freq/phase table (shared)
        ],
        out_specs=pl.BlockSpec((tb, w), lambda i: (i, 0)),
        compiler_params=pltpu.CompilerParams(
            # Only a real lever on v7x (2 TCs); harmless on v5e/v6e.
            dimension_semantics=("parallel",)),
    )(time_packed, table)

    out = packed.reshape(b_pad, dim)                     # pure view: unpack lane groups
    return out[:b] if b_pad != b else out


def _reference(time: jax.Array, dim: int) -> jax.Array:
    half_dim = dim // 2
    scale = math.log(10000.0) / (half_dim - 1)
    freqs = jnp.exp(jnp.arange(half_dim, dtype=jnp.float32) * (-scale))
    emb = time.astype(jnp.float32)[:, None] * freqs[None, :]
    return jnp.concatenate([jnp.sin(emb), jnp.cos(emb)], axis=-1)


if __name__ == "__main__":
    key = jax.random.PRNGKey(0)
    batch = 8
    dim = 32

    # Deterministic example timesteps (like diffusion timestep indices).
    time = jax.random.randint(key, (batch,), 0, 1000).astype(jnp.float32)

    out = sinusoidal_position_embedding(time, dim)
    out = jax.block_until_ready(out)

    ref = _reference(time, dim)
    assert out.shape == (batch, dim), out.shape
    # Tolerance covers (a) cos computed as sin(x + pi/2) (adds ~ulp(|arg|) error
    # for |arg| ~ 1e3) and (b) differences between the TPU kernel's sin
    # range-reduction/approximation and XLA's sin/cos.
    assert jnp.allclose(out, ref, atol=2e-3, rtol=2e-3), "mismatch vs reference"

    print("KERNEL_OK")
</pallas_src>

<mosaic_0001>
module attributes {stable_mosaic.version = 11 : i64} {
  func.func @_sinusoidal_embed_kernel(%arg0: i32, %arg1: memref<2x4xf32, #tpu.memory_space<vmem>>, %arg2: memref<2x128xf32, #tpu.memory_space<vmem>>, %arg3: memref<2x128xf32, #tpu.memory_space<vmem>>) attributes {dimension_semantics = [#tpu.dimension_semantics<parallel>], iteration_bounds = array<i64: 1>, scalar_prefetch = 0 : i64, scratch_operands = 0 : i64, tpu.core_type = #tpu.core_type<tc>, window_params = [{transform_indices = @transform_0, window_bounds = array<i64: 2, 4>}, {pipeline_mode = #tpu.pipeline_mode<synchronous>, transform_indices = @transform_1, window_bounds = array<i64: 2, 128>}, {transform_indices = @transform_2, window_bounds = array<i64: 2, 128>}]} {
    %c0 = arith.constant 0 : index
    %c0_0 = arith.constant 0 : index
    %0 = vector.load %arg2[%c0, %c0_0] : memref<2x128xf32, #tpu.memory_space<vmem>>, vector<2x128xf32>
    %1 = vector.extract_strided_slice %0 {offsets = [0, 0], sizes = [1, 128], strides = [1, 1]} : vector<2x128xf32> to vector<1x128xf32>
    %2 = vector.extract_strided_slice %0 {offsets = [1, 0], sizes = [1, 128], strides = [1, 1]} : vector<2x128xf32> to vector<1x128xf32>
    %c0_1 = arith.constant 0 : index
    %c0_2 = arith.constant 0 : index
    %3 = vector.load %arg1[%c0_1, %c0_2] : memref<2x4xf32, #tpu.memory_space<vmem>>, vector<2x4xf32>
    %4 = vector.extract_strided_slice %3 {offsets = [0, 0], sizes = [2, 1], strides = [1, 1]} : vector<2x4xf32> to vector<2x1xf32>
    %5 = vector.shape_cast %4 : vector<2x1xf32> to vector<2x1xf32>
    %6 = vector.broadcast %5 : vector<2x1xf32> to vector<2x32xf32>
    %7 = vector.extract_strided_slice %3 {offsets = [0, 1], sizes = [2, 1], strides = [1, 1]} : vector<2x4xf32> to vector<2x1xf32>
    %8 = vector.shape_cast %7 : vector<2x1xf32> to vector<2x1xf32>
    %9 = vector.broadcast %8 : vector<2x1xf32> to vector<2x32xf32>
    %10 = vector.extract_strided_slice %3 {offsets = [0, 2], sizes = [2, 1], strides = [1, 1]} : vector<2x4xf32> to vector<2x1xf32>
    %11 = vector.shape_cast %10 : vector<2x1xf32> to vector<2x1xf32>
    %12 = vector.broadcast %11 : vector<2x1xf32> to vector<2x32xf32>
    %13 = vector.extract_strided_slice %3 {offsets = [0, 3], sizes = [2, 1], strides = [1, 1]} : vector<2x4xf32> to vector<2x1xf32>
    %14 = vector.shape_cast %13 : vector<2x1xf32> to vector<2x1xf32>
    %15 = vector.broadcast %14 : vector<2x1xf32> to vector<2x32xf32>
    %16 = tpu.concatenate %6, %9, %12, %15 in 1 : vector<2x32xf32>, vector<2x32xf32>, vector<2x32xf32>, vector<2x32xf32> -> vector<2x128xf32>
    %17 = vector.broadcast %1 : vector<1x128xf32> to vector<2x128xf32>
    %18 = arith.mulf %16, %17 : vector<2x128xf32>
    %19 = vector.broadcast %2 : vector<1x128xf32> to vector<2x128xf32>
    %20 = arith.addf %18, %19 : vector<2x128xf32>
    %21 = math.sin %20 : vector<2x128xf32>
    %c0_3 = arith.constant 0 : index
    %c0_4 = arith.constant 0 : index
    %22 = vector.load %arg3[%c0_3, %c0_4] : memref<2x128xf32, #tpu.memory_space<vmem>>, vector<2x128xf32>
    tpu.vector_store %arg3[%c0_3, %c0_4], %21 {strides = array<i32>} : memref<2x128xf32, #tpu.memory_space<vmem>>, vector<2x128xf32>,
    return
  }
  func.func @transform_0(%arg0: i32) -> (i32, i32) {
    %c0_i32 = arith.constant 0 : i32
    %c0_i32_0 = arith.constant 0 : i32
    return %arg0, %c0_i32 : i32, i32
  }
  func.func @transform_1(%arg0: i32) -> (i32, i32) {
    %c0_i32 = arith.constant 0 : i32
    %c0_i32_0 = arith.constant 0 : i32
    %c0_i32_1 = arith.constant 0 : i32
    return %c0_i32, %c0_i32_0 : i32, i32
  }
  func.func @transform_2(%arg0: i32) -> (i32, i32) {
    %c0_i32 = arith.constant 0 : i32
    %c0_i32_0 = arith.constant 0 : i32
    return %arg0, %c0_i32 : i32, i32
  }
}

</mosaic_0001>

<bundles_post_ra>
// kernel: tpu_custom_call.1
= control target key start
LH: loop header
LB: loop body
LE: loop exit
PB: predicated region body
PF: predicated region fallthrough
CT: control target
= control target key end

     0   :  { %7 = vsyncpa [#allocation3], 0  ;;  %s331_s0 = inlined_call_operand.hbm [shape: f32[2,4], index: 0, kind: input, shape index: {}]   ;;  %s332_s1 = inlined_call_operand.vmem [shape: f32[2,128], index: 1, kind: input, shape index: {}]   ;;  %s333_s2 = inlined_call_operand.hbm [shape: f32[2,128], index: 2, kind: output, shape index: {}]  }
   0x1   :  { %8 = vsyncpa [#allocation4], 0  ;;  %s256_s9 = smov [#allocation2]   ;;  %s208_s13 = scalar_lea.hbm %s331_s0, 32 }
   0x2   :  { %s15_s10 = sshll.u32 %s256_s9, 4  ;;  %p209_p0 = scmp.ne.s32.totalorder %s331_s0, %s208_s13  ;;  %s16_s10 = int_to_ptr.vmem [resolvable:$true] %s15_s10 }
   0x3   :  { %p212_p1 = scmp.lt.u32.totalorder %s208_s13, %s331_s0 }
   0x5   :  { %p214_p2 = pnand %p212_p1, %p209_p0 }
   0x7   :  { %217 = shalt.err (!%p214_p2)
}
   0x8   :  { %s218_s18 = scalar_lea.vmem %s16_s10, 32  ;;  %p223_p4 = scmp.lt.s32.totalorder %s16_s10, %s16_s10 }
   0x9   :  { %p219_p3 = scmp.ne.s32.totalorder %s16_s10, %s218_s18  ;;  %p224_p5 = scmp.lt.s32.totalorder %s218_s18, %s218_s18 }
   0xb   :  { %p225_p6 = por %p224_p5, %p223_p4 }
   0xd   :  { %p226_p7 = pnand %p225_p6, %p219_p3 }
   0xf   :  { %229 = shalt.err (!%p226_p7)
}
  0x10   :  { %18 = dma.hbm_to_vmem [thread:$0]  %s331_s0, 32, %s16_s10, [#allocation3]  }
  0x11   :  { %252 = dma.done.wait [#allocation3], 32  }
  0x12   :  { %253 = vsyncadd [#allocation3], 4294967264  ;;  %v257_v0 = vmov 0   ;;  %v258_v1 = vmov 2   ;;  %v25_v2 = vld [vmem:[#allocation2] sm:$0x3]  ;;  %v49_v5 = vlaneseq }
  0x13   :  { %199 = vset.pattern.permute.xlu0 %v257_v0  ;;  %201 = vset.pattern.permute.xlu1 %v258_v1  ;;  %v259_v3 = vmov 1   ;;  %v260_v4 = vmov 3   ;;  %v24_v10 = vld [vmem:[%s332_s1] sm:$0x3]  ;;  %vm43_vm0 = vcmask 261120   ;;  %vm45_vm1 = vcmask 523264  }
  0x14   :  { %28 = vperm.xlu0 %199, %v25_v2   ;;  %36 = vperm.xlu1 %201, %v25_v2   ;;  %v50_v6 = vshrl.u32 %v49_v5, 7  ;;  %vm47_vm2 = vcmask 785408   ;;  %v261_v31 = vmov 683565275   ;;  %v262_v33 = vmov 2475754826  }
  0x15   :  { %v263_v36 = vmov 2131351028   ;;  %v264_v39 = vmov 2102212464   ;;  %v265_v42 = vmov 920167782  }
  0x16   :  { %v51_v9 = vsub.s32 0, %v50_v6  ;;  %v56_v11 = vsub.s32 1, %v50_v6  ;;  %v266_v45 = vmov 1326507024   ;;  %s267_s1 = smov [#allocation5]  }
  0x17   :  { %s170_s22 = sshll.u32 %s267_s1, 4  ;;  %s171_s22 = int_to_ptr.vmem [resolvable:$true] %s170_s22 }
  0x18   :  { %200 = vset.pattern.permute.xlu0 %v259_v3  ;;  %202 = vset.pattern.permute.xlu1 %v260_v4  ;;  %v52_v14 = vrot.slane %v24_v10, %v51_v9  ;;  %v57_v17 = vrot.slane %v24_v10, %v56_v11  ;;  %s230_s23 = scalar_lea.vmem %s171_s22, 32  ;;  %p235_p9 = scmp.lt.s32.totalorder %s171_s22, %s171_s22 }
  0x19   :  { %32 = vperm.xlu0 %200, %v25_v2   ;;  %40 = vperm.xlu1 %202, %v25_v2   ;;  %p231_p8 = scmp.ne.s32.totalorder %s171_s22, %s230_s23  ;;  %p236_p10 = scmp.lt.s32.totalorder %s230_s23, %s230_s23 }
  0x1b   :  { %p237_p11 = por %p236_p10, %p235_p9 }
  0x1d   :  { %203 = vset.pattern.permute.xlu0 %v260_v4  ;;  %p238_p12 = pnand %p237_p11, %p231_p8 }
  0x93   :  { %v29_v7 = vpop.permute.xlu0 %28  ;;  %v37_v8 = vpop.permute.xlu1 %36 }
  0x98   :  { %v33_v12 = vpop.permute.xlu0 %32  ;;  %v41_v13 = vpop.permute.xlu1 %40 }
  0x99   :  { %v44_v15 = vsel %vm43_vm0, %v29_v7, %v33_v12 }
  0x9a   :  { %v46_v16 = vsel %vm45_vm1, %v44_v15, %v37_v8 }
  0x9b   :  { %v48_v18 = vsel %vm47_vm2, %v46_v16, %v41_v13 }
  0x9c   :  { %v53_v19 = vmul.f32 %v52_v14, %v48_v18 }
  0x9e   :  { %v298_v20 = vadd.f32 %v57_v17, %v53_v19 }
  0xa0   :  { %v62_v21 = vand.u32 2139095040, %v298_v20  ;;  %v59_v25 = vand.u32 2147483647, %v298_v20  ;;  %vm61_vm10 = vcmp.lt.s32.totalorder %v298_v20, 0  ;;  %vm151_vm15 = vweird.f32 %v298_v20 }
  0xa2   :  { %v63_v22 = vshrl.u32 %v62_v21, 23  ;;  %v66_v29 = vand.u32 8388607, %v59_v25  ;;  %vm60_vm11 = vcmp.le.f32.partialorder %v59_v25, 0.7853982 }
  0xa4   :  { %v179_v23 = vadd.s32 4294967169, %v63_v22  ;;  %v67_v47 = vor.u32 8388608, %v66_v29 }
  0xa6   :  { %v69_v24 = vadd.s32 1, %v179_v23  ;;  %v107_v61 = vshll.u32 %v67_v47, 8 }
  0xa8   :  { %vm70_vm3 = vcmp.gt.s32.totalorder %v69_v24, 0 }
  0xa9   :  { %v71_v26 = vsel %vm70_vm3, %v69_v24, 0 }
  0xaa   :  { %v73_v27 = vand.u32 31, %v71_v26  ;;  %v72_v30 = vshrl.u32 %v71_v26, 5 }
  0xac   :  { %v74_v28 = vsub.s32 32, %v73_v27  ;;  %v76_v32 = vshll.u32 %v261_v31, %v73_v27  ;;  %v79_v34 = vshll.u32 %v262_v33, %v73_v27  ;;  %v82_v38 = vshll.u32 %v263_v36, %v73_v27 }
  0xad   :  { %v85_v41 = vshll.u32 %v264_v39, %v73_v27  ;;  %v88_v44 = vshll.u32 %v265_v42, %v73_v27  ;;  %vm91_vm4 = vcmp.lt.s32.totalorder %v72_v30, 1  ;;  %vm94_vm5 = vcmp.lt.s32.totalorder %v72_v30, 4 }
  0xae   :  { %v77_v35 = vshrl.u32 %v262_v33, %v74_v28  ;;  %v80_v37 = vshrl.u32 %v263_v36, %v74_v28  ;;  %v83_v40 = vshrl.u32 %v264_v39, %v74_v28  ;;  %v86_v43 = vshrl.u32 %v265_v42, %v74_v28 }
  0xaf   :  { %v89_v46 = vshrl.u32 %v266_v45, %v74_v28  ;;  %v75_v56 = vshrl.u32 %v261_v31, %v74_v28  ;;  %vm93_vm6 = vcmp.lt.s32.totalorder %v72_v30, 3  ;;  %vm92_vm7 = vcmp.lt.s32.totalorder %v72_v30, 2 }
  0xb0   :  { %v78_v48 = vor.u32 %v77_v35, %v76_v32  ;;  %v81_v49 = vor.u32 %v80_v37, %v79_v34  ;;  %v84_v50 = vor.u32 %v83_v40, %v82_v38  ;;  %v87_v51 = vor.u32 %v86_v43, %v85_v41 }
  0xb1   :  { %v90_v52 = vor.u32 %v89_v46, %v88_v44 }
  0xb2   :  { %v96_v53 = vsel %vm94_vm5, %v84_v50, 2102212464  ;;  %v99_v54 = vsel %vm91_vm4, %v78_v48, %v81_v49  ;;  %v103_v55 = vsel %vm91_vm4, %v81_v49, %v84_v50  ;;  %v100_v57 = vsel %vm94_vm5, %v87_v51, 920167782 }
  0xb3   :  { %v104_v58 = vsel %vm94_vm5, %v90_v52, 1326507024  ;;  %v101_v59 = vsel %vm93_vm6, %v84_v50, %v100_v57  ;;  %v95_v62 = vsel %vm91_vm4, %v75_v56, %v78_v48  ;;  %v97_v63 = vsel %vm93_vm6, %v81_v49, %v96_v53 }
  0xb4   :  { %v105_v60 = vsel %vm93_vm6, %v87_v51, %v104_v58  ;;  %v102_v0 = vsel %vm92_vm7, %v99_v54, %v101_v59  ;;  %v98_v6 = vsel %vm92_vm7, %v95_v62, %v97_v63 }
  0xb5   :  { %v106_v1 = vsel %vm92_vm7, %v103_v55, %v105_v60  ;;  %v307_v4 = vmul.u32.u64.low %v107_v61, %v102_v0  ;;  %v308_v5 = vmul.u32.u64.high %v107_v61, %v102_v0, %v307_v4  ;;  %v114_v8 = vmul.u32 %v107_v61, %v98_v6 }
  0xb6   :  { %v304_v2 = vmul.u32.u64.low %v107_v61, %v106_v1  ;;  %v305_v3 = vmul.u32.u64.high %v107_v61, %v106_v1, %v304_v2 }
  0xb7   :  { %v117_v7 = vadd.s32 1, %v308_v5 }
  0xb8   :  { %vm116_vm8 = vc.u32 %v305_v3, %v307_v4  ;;  %v115_v21 = vadd.s32 %v307_v4, %v305_v3 }
  0xb9   :  { %v118_v9 = vsel %vm116_vm8, %v117_v7, %v308_v5 }
  0xba   :  { %v119_v10 = vadd.s32 %v118_v9, %v114_v8 }
  0xbc   :  { %v120_v11 = vadd.s32 536870912, %v119_v10 }
  0xbe   :  { %v121_v12 = vshrl.u32 %v120_v11, 30 }
  0xc0   :  { %v122_v13 = vshll.u32 %v121_v12, 30  ;;  %v145_v34 = vsub.s32 4, %v121_v12 }
  0xc2   :  { %v123_v14 = vsub.s32 %v119_v10, %v122_v13  ;;  %v146_v37 = vsel %vm61_vm10, %v145_v34, %v121_v12 }
  0xc3   :  { %v148_v39 = vsel %vm60_vm11, 0, %v146_v37 }
  0xc4   :  { %v125_v15 = vsub.s32 0, %v123_v14  ;;  %v152_v40 = vadd.s32 3, %v148_v39 }
  0xc6   :  { %v180_v16 = vmin.u32 %v125_v15, %v123_v14  ;;  %v153_v41 = vand.u32 3, %v152_v40 }
  0xc8   :  { %v127_v17 = vclz %v180_v16  ;;  %vm158_vm12 = vcmp.eq.s32.totalorder %v153_v41, 2  ;;  %vm155_vm13 = vcmp.eq.s32.totalorder %v153_v41, 0  ;;  %vm154_vm14 = vcmp.lt.s32.totalorder %v153_v41, 2 }
  0xca   :  { %v181_v18 = vadd.s32 4294967294, %v127_v17 }
  0xcc   :  { %vm182_vm9 = vcmp.lt.s32.totalorder %v181_v18, 0 }
  0xcd   :  { %v130_v19 = vsel %vm182_vm9, 0, %v181_v18 }
  0xce   :  { %v131_v22 = vsub.s32 32, %v130_v19  ;;  %v135_v23 = vsub.s32 4294967266, %v130_v19  ;;  %v132_v24 = vshll.u32 %v123_v14, %v130_v19 }
  0xd0   :  { %v133_v26 = vshrl.u32 %v115_v21, %v131_v22  ;;  %v136_v27 = vadd.s32 127, %v135_v23 }
  0xd2   :  { %v134_v28 = vor.u32 %v133_v26, %v132_v24  ;;  %v137_v29 = vshll.u32 %v136_v27, 23 }
  0xd4   :  { %v138_v30 = vor.u32 4788187, %v137_v29  ;;  %v141_v32 = vcvt.s32.f32 %v134_v28 }
  0xd6   :  { %v139_v31 = vand.u32 2147483647, %v138_v30 }
  0xd8   :  { %v142_v33 = vmul.f32 %v141_v32, %v139_v31 }
  0xda   :  { %v143_v35 = vxor.u32 2147483648, %v142_v33 }
  0xdc   :  { %v144_v36 = vsel %vm61_vm10, %v143_v35, %v142_v33 }
  0xdd   :  { %v147_v38 = vsel %vm60_vm11, %v298_v20, %v144_v36 }
  0xde   :  { %204 = vcosq.f32 %v147_v38 }
  0xdf   :  { %206 = vsinq.f32 %v147_v38 }
  0xe8   :  { %v205_v42 = vpop.eup %204 }
  0xe9   :  { %v207_v43 = vpop.eup %206  ;;  %v159_v44 = vxor.u32 2147483648, %v205_v42 }
  0xea   :  { %v156_v45 = vxor.u32 2147483648, %v207_v43 }
  0xeb   :  { %v160_v46 = vsel %vm158_vm12, %v159_v44, %v207_v43 }
  0xec   :  { %v157_v25 = vsel %vm155_vm13, %v205_v42, %v156_v45 }
  0xed   :  { %v161_v47 = vsel %vm154_vm14, %v157_v25, %v160_v46 }
  0xee   :  { %v162_v48 = vsel %vm151_vm15, nan, %v161_v47 }
  0xef   :  { %163 = vst [vmem:[#allocation5] sm:$0x3] %v162_v48 }
  0xf0   :  { %241 = shalt.err (!%p238_p12)
}
  0xf1   :  { %s242_s26 = scalar_lea.hbm %s333_s2, 32 }
  0xf2   :  { %p243_p13 = scmp.ne.s32.totalorder %s333_s2, %s242_s26  ;;  %p246_p0 = scmp.lt.u32.totalorder %s242_s26, %s333_s2 }
  0xf4   :  { %p248_p1 = pnand %p246_p0, %p243_p13 }
  0xf6   :  { %251 = shalt.err (!%p248_p1)
}
  0xf7   :  { %173 = dma.vmem_to_hbm [thread:$0]  %s171_s22, 32, %s333_s2, [#allocation4]  }
  0xf8   :  { %254 = dma.done.wait [#allocation4], 32  }
  0xf9   :  { %255 = vsyncadd [#allocation4], 4294967264 }
  0xfa   :  { %177 = vsyncpa [#allocation3], 1 }
  0xfb   :  { %178 = vsyncpa [#allocation4], 1 }

</bundles_post_ra>
